<compile_context>
chip_gen: v6e
topology: v6e:2x2x1
jax: 0.10.0
libtpu: 0.0.40
codegen_flags: <defaults>
</compile_context>

<pallas_src>
import functools

import jax
import jax.numpy as jnp
from jax import lax
from jax.experimental import pallas as pl
from jax.experimental.pallas import tpu as pltpu


_LANE = 128
_NCORES = 2                      # v7x megacore K-split; harmless serial loop on v5e/v6e
_MAX_TK = 32 * 1024              # lane-width ceiling for a single K tile
_VMEM_BUDGET = 36 * 1024 * 1024  # bytes we size our buffers against
_VMEM_LIMIT = 48 * 1024 * 1024   # scoped-VMEM request (safe within v7x's 64 MiB physical)


def _round_up(x, m):
    return (x + m - 1) // m * m


def _k_tiling(ab, cd, itemsize):
    """Pick (tk, nt): tk multiple of 128 sized against the VMEM budget, nt=ceil(cd/tk)."""
    cd128 = _round_up(cd, _LANE)
    fixed = 3 * ab * ab * 4                 # f32 accumulator + double-buffered (ab,ab) out
    per_lane = 2 * ab * itemsize            # double-buffered streamed-F tile, per K lane
    avail = _VMEM_BUDGET - fixed
    tk = avail // per_lane if avail > 0 else _LANE
    tk = min(tk, _MAX_TK, cd128)
    tk = max(_LANE, (tk // _LANE) * _LANE)
    nt = pl.cdiv(cd, tk)                    # number of real K tiles
    return tk, nt


def _prepare_features(x):
    """x (a,b,c,d) -> (F in bf16, ab, cd).  No HBM padding copy."""
    a, b, c, d = x.shape
    ab, cd = a * b, c * d
    f = x.reshape(ab, cd)
    if f.dtype != jnp.bfloat16:
        # MXU-native stream dtype; f32 accumulation happens in-kernel.
        f = f.astype(jnp.bfloat16)
    return f, ab, cd


def _accumulate_gram(acc_ref, f, g, tk, nt, cd):
    """Accumulate F_tile @ F_tile^T into acc_ref, masking the ragged tail tile."""

    @pl.when(g < nt - 1)                       # interior tiles: no masking needed
    def _():
        acc_ref[...] += lax.dot_general(
            f, f, (((1,), (1,)), ((), ())), preferred_element_type=jnp.float32)

    @pl.when(g == nt - 1)                      # tail tile: zero lanes >= cd in-kernel
    def _():
        col = g * tk + lax.broadcasted_iota(jnp.int32, f.shape, 1)
        fm = jnp.where(col < cd, f, jnp.zeros_like(f))
        acc_ref[...] += lax.dot_general(
            fm, fm, (((1,), (1,)), ((), ())), preferred_element_type=jnp.float32)

    # g > nt - 1: phantom tile (odd nt split across cores) -- contributes nothing.


# ----------------------------------------------------------------------------
# Gram matrix kernel (used once to build the detached target).
# ----------------------------------------------------------------------------
def _gram_kernel(f_ref, g_ref, acc_ref, *, ab, cd, tk, nt):
    k = pl.program_id(0)

    @pl.when(k == 0)
    def _():
        acc_ref[...] = jnp.zeros_like(acc_ref)

    _accumulate_gram(acc_ref, f_ref[...], k, tk, nt, cd)

    @pl.when(k == nt - 1)
    def _():
        g_ref[...] = acc_ref[...] * jnp.float32(1.0 / (ab * cd))


def gram_matrix(x):
    """Pallas equivalent of torch gram_matrix(x) for NCHW input x (f32 result)."""
    f, ab, cd = _prepare_features(x)
    tk, nt = _k_tiling(ab, cd, f.dtype.itemsize)
    kernel = functools.partial(_gram_kernel, ab=ab, cd=cd, tk=tk, nt=nt)
    return pl.pallas_call(
        kernel,
        out_shape=jax.ShapeDtypeStruct((ab, ab), jnp.float32),
        grid_spec=pltpu.PrefetchScalarGridSpec(
            num_scalar_prefetch=0,
            grid=(nt,),
            in_specs=[pl.BlockSpec((ab, tk), lambda k: (0, k))],
            out_specs=pl.BlockSpec((ab, ab), lambda k: (0, 0)),
            scratch_shapes=[pltpu.VMEM((ab, ab), jnp.float32)],
        ),
        compiler_params=pltpu.CompilerParams(
            dimension_semantics=("arbitrary",),
            vmem_limit_bytes=_VMEM_LIMIT),
        cost_estimate=pl.CostEstimate(
            flops=2 * ab * ab * cd,
            transcendentals=0,
            bytes_accessed=ab * nt * tk * f.dtype.itemsize + ab * ab * 4),
    )(f)


# ----------------------------------------------------------------------------
# Style loss: K-split partial-Gram kernel + tiny MSE epilogue kernel.
# ----------------------------------------------------------------------------
def _gram_partial_kernel(f_ref, part_ref, acc_ref, *, cd, tk, nk, nt):
    c = pl.program_id(0)            # which half of K (maps to a TensorCore on v7x)
    k = pl.program_id(1)            # K-tile index within the half
    g = c * nk + k                  # global K-tile index

    @pl.when(k == 0)
    def _():
        acc_ref[...] = jnp.zeros_like(acc_ref)

    _accumulate_gram(acc_ref, f_ref[...], g, tk, nt, cd)

    @pl.when(k == nk - 1)
    def _():
        part_ref[...] = acc_ref[...]          # unscaled partial Gram for this half


def _mse_epilogue_kernel(parts_ref, tgt_ref, loss_ref, *, ab, cd, ncores):
    g = parts_ref[0]
    for c in range(1, ncores):                # static unroll over the partials
        g = g + parts_ref[c]
    g = g * jnp.float32(1.0 / (ab * cd))
    diff = g - tgt_ref[...].astype(jnp.float32)
    loss_ref[0, 0] = jnp.sum(diff * diff) * jnp.float32(1.0 / (ab * ab))


def style_loss_forward(x, target_gram):
    f, ab, cd = _prepare_features(x)
    tk, nt = _k_tiling(ab, cd, f.dtype.itemsize)
    nk = pl.cdiv(nt, _NCORES)

    part_kernel = functools.partial(_gram_partial_kernel, cd=cd, tk=tk, nk=nk, nt=nt)
    partials = pl.pallas_call(
        part_kernel,
        out_shape=jax.ShapeDtypeStruct((_NCORES, ab, ab), jnp.float32),
        grid_spec=pltpu.PrefetchScalarGridSpec(
            num_scalar_prefetch=0,
            grid=(_NCORES, nk),
            in_specs=[pl.BlockSpec(
                (ab, tk),
                # Clamp so the (at most one) phantom tile never DMAs out of bounds;
                # its contribution is skipped in-kernel.
                lambda c, k: (0, jnp.minimum(c * nk + k, nt - 1)))],
            out_specs=pl.BlockSpec((None, ab, ab), lambda c, k: (c, 0, 0)),
            scratch_shapes=[pltpu.VMEM((ab, ab), jnp.float32)],
        ),
        compiler_params=pltpu.CompilerParams(
            dimension_semantics=("parallel", "arbitrary"),
            vmem_limit_bytes=_VMEM_LIMIT),
        cost_estimate=pl.CostEstimate(
            flops=2 * ab * ab * cd,
            transcendentals=0,
            bytes_accessed=ab * (_NCORES * nk) * tk * f.dtype.itemsize
                           + _NCORES * ab * ab * 4),
    )(f)

    mse_kernel = functools.partial(_mse_epilogue_kernel, ab=ab, cd=cd, ncores=_NCORES)
    loss = pl.pallas_call(
        mse_kernel,
        out_shape=jax.ShapeDtypeStruct((1, 1), jnp.float32),
        in_specs=[pl.BlockSpec(memory_space=pltpu.MemorySpace.VMEM),
                  pl.BlockSpec(memory_space=pltpu.MemorySpace.VMEM)],
        out_specs=pl.BlockSpec(memory_space=pltpu.MemorySpace.SMEM),
    )(partials, target_gram.astype(jnp.float32))

    # nn.Module.forward returns x unchanged; the MSE loss is a side output.
    return x, loss[0, 0]


class StyleLoss:
    """JAX/Pallas port of the PyTorch StyleLoss module."""

    def __init__(self, target_feature):
        # Target Gram matrix computed once (detached constant).
        self.target = gram_matrix(target_feature)
        self.loss = None

    def __call__(self, x):
        out, self.loss = style_loss_forward(x, self.target)
        return out


if __name__ == "__main__":
    key = jax.random.PRNGKey(0)
    k_tgt, k_x = jax.random.split(key)

    # Small NCHW shapes: batch=2, channels=4, spatial=16x16  ->  ab=8, cd=256
    target_feature = jax.random.normal(k_tgt, (2, 4, 16, 16), dtype=jnp.float32)
    x = jax.random.normal(k_x, (2, 4, 16, 16), dtype=jnp.float32)

    module = StyleLoss(target_feature)
    out = module(x)

    out = jax.block_until_ready(out)
    loss = jax.block_until_ready(module.loss)

    # Pure-JAX reference.  The kernel intentionally streams features as bf16
    # (per perf review), so the reference quantizes the same way; this checks
    # the kernel math tightly while the quantization itself is by design.
    def _gram_ref(t):
        a, b, c, d = t.shape
        ft = t.reshape(a * b, c * d).astype(jnp.bfloat16).astype(jnp.float32)
        return (ft @ ft.T) / (a * b * c * d)

    g_tgt_ref = _gram_ref(target_feature)
    loss_ref = jnp.mean((_gram_ref(x) - g_tgt_ref) ** 2)

    assert out.shape == x.shape
    assert bool(jnp.all(out == x))                 # forward is identity on x
    assert bool(jnp.isfinite(loss))
    assert bool(jnp.allclose(module.target, g_tgt_ref, rtol=1e-3, atol=1e-6))
    assert bool(jnp.allclose(loss, loss_ref, rtol=5e-3, atol=1e-7))

    print("KERNEL_OK")
</pallas_src>

<mosaic_0001>
module attributes {stable_mosaic.version = 11 : i64} {
  func.func @_gram_kernel(%arg0: i32, %arg1: memref<8x256xbf16, #tpu.memory_space<vmem>>, %arg2: memref<8x8xf32, #tpu.memory_space<vmem>>, %arg3: memref<8x8xf32, #tpu.memory_space<vmem>>) attributes {dimension_semantics = [#tpu.dimension_semantics<arbitrary>], iteration_bounds = array<i64: 1>, scalar_prefetch = 0 : i64, scratch_operands = 1 : i64, tpu.core_type = #tpu.core_type<tc>, window_params = [{transform_indices = @transform_0, window_bounds = array<i64: 8, 256>}, {pipeline_mode = #tpu.pipeline_mode<synchronous>, transform_indices = @transform_1, window_bounds = array<i64: 8, 8>}]} {
    %c0_i32 = arith.constant 0 : i32
    %0 = arith.cmpi eq, %arg0, %c0_i32 : i32
    %1 = arith.extui %0 : i1 to i32
    %c0_i32_0 = arith.constant 0 : i32
    %2 = arith.cmpi ne, %1, %c0_i32_0 : i32
    scf.if %2 {
      %cst = arith.constant 0.000000e+00 : f32
      %13 = vector.broadcast %cst : f32 to vector<8x8xf32>
      %c0_8 = arith.constant 0 : index
      %c0_9 = arith.constant 0 : index
      %14 = vector.load %arg3[%c0_8, %c0_9] : memref<8x8xf32, #tpu.memory_space<vmem>>, vector<8x8xf32>
      tpu.vector_store %arg3[%c0_8, %c0_9], %13 {strides = array<i32>} : memref<8x8xf32, #tpu.memory_space<vmem>>, vector<8x8xf32>,
    } else {
    }
    %c0 = arith.constant 0 : index
    %c0_1 = arith.constant 0 : index
    %3 = vector.load %arg1[%c0, %c0_1] : memref<8x256xbf16, #tpu.memory_space<vmem>>, vector<8x256xbf16>
    %c0_i32_2 = arith.constant 0 : i32
    %4 = arith.cmpi slt, %arg0, %c0_i32_2 : i32
    %5 = arith.extui %4 : i1 to i32
    %c0_i32_3 = arith.constant 0 : i32
    %6 = arith.cmpi ne, %5, %c0_i32_3 : i32
    scf.if %6 {
      %c0_8 = arith.constant 0 : index
      %c0_9 = arith.constant 0 : index
      %13 = vector.load %arg3[%c0_8, %c0_9] : memref<8x8xf32, #tpu.memory_space<vmem>>, vector<8x8xf32>
      %cst = arith.constant dense<0.000000e+00> : vector<8x8xf32>
      %14 = tpu.matmul %3, %3, %cst {dimension_numbers = #tpu.dot_dimension_numbers<[1], [1], [0], [0], [0, 0, 1, 0], [], []>} : vector<8x256xbf16>, vector<8x256xbf16>, vector<8x8xf32> -> vector<8x8xf32>
      %15 = arith.addf %13, %14 : vector<8x8xf32>
      %c0_10 = arith.constant 0 : index
      %c0_11 = arith.constant 0 : index
      %16 = vector.load %arg3[%c0_10, %c0_11] : memref<8x8xf32, #tpu.memory_space<vmem>>, vector<8x8xf32>
      tpu.vector_store %arg3[%c0_10, %c0_11], %15 {strides = array<i32>} : memref<8x8xf32, #tpu.memory_space<vmem>>, vector<8x8xf32>,
    } else {
    }
    %c0_i32_4 = arith.constant 0 : i32
    %7 = arith.cmpi eq, %arg0, %c0_i32_4 : i32
    %8 = arith.extui %7 : i1 to i32
    %c0_i32_5 = arith.constant 0 : i32
    %9 = arith.cmpi ne, %8, %c0_i32_5 : i32
    scf.if %9 {
      %c256_i32 = arith.constant 256 : i32
      %13 = arith.muli %arg0, %c256_i32 : i32
      %14 = tpu.iota {dimensions = array<i32: 1>} : vector<8x256xi32>
      %15 = vector.broadcast %13 : i32 to vector<8x256xi32>
      %16 = arith.addi %15, %14 : vector<8x256xi32>
      %c256_i32_8 = arith.constant 256 : i32
      %17 = vector.broadcast %c256_i32_8 : i32 to vector<8x256xi32>
      %18 = arith.cmpi slt, %16, %17 : vector<8x256xi32>
      %cst = arith.constant 0.000000e+00 : bf16
      %19 = vector.broadcast %cst : bf16 to vector<8x256xbf16>
      %20 = arith.select %18, %3, %19 : vector<8x256xi1>, vector<8x256xbf16>
      %c0_9 = arith.constant 0 : index
      %c0_10 = arith.constant 0 : index
      %21 = vector.load %arg3[%c0_9, %c0_10] : memref<8x8xf32, #tpu.memory_space<vmem>>, vector<8x8xf32>
      %cst_11 = arith.constant dense<0.000000e+00> : vector<8x8xf32>
      %22 = tpu.matmul %20, %20, %cst_11 {dimension_numbers = #tpu.dot_dimension_numbers<[1], [1], [0], [0], [0, 0, 1, 0], [], []>} : vector<8x256xbf16>, vector<8x256xbf16>, vector<8x8xf32> -> vector<8x8xf32>
      %23 = arith.addf %21, %22 : vector<8x8xf32>
      %c0_12 = arith.constant 0 : index
      %c0_13 = arith.constant 0 : index
      %24 = vector.load %arg3[%c0_12, %c0_13] : memref<8x8xf32, #tpu.memory_space<vmem>>, vector<8x8xf32>
      tpu.vector_store %arg3[%c0_12, %c0_13], %23 {strides = array<i32>} : memref<8x8xf32, #tpu.memory_space<vmem>>, vector<8x8xf32>,
    } else {
    }
    %c0_i32_6 = arith.constant 0 : i32
    %10 = arith.cmpi eq, %arg0, %c0_i32_6 : i32
    %11 = arith.extui %10 : i1 to i32
    %c0_i32_7 = arith.constant 0 : i32
    %12 = arith.cmpi ne, %11, %c0_i32_7 : i32
    scf.if %12 {
      %c0_8 = arith.constant 0 : index
      %c0_9 = arith.constant 0 : index
      %13 = vector.load %arg3[%c0_8, %c0_9] : memref<8x8xf32, #tpu.memory_space<vmem>>, vector<8x8xf32>
      %cst = arith.constant 4.8828125E-4 : f32
      %14 = vector.broadcast %cst : f32 to vector<8x8xf32>
      %15 = arith.mulf %13, %14 : vector<8x8xf32>
      %c0_10 = arith.constant 0 : index
      %c0_11 = arith.constant 0 : index
      %16 = vector.load %arg2[%c0_10, %c0_11] : memref<8x8xf32, #tpu.memory_space<vmem>>, vector<8x8xf32>
      tpu.vector_store %arg2[%c0_10, %c0_11], %15 {strides = array<i32>} : memref<8x8xf32, #tpu.memory_space<vmem>>, vector<8x8xf32>,
    } else {
    }
    return
  }
  func.func @transform_0(%arg0: i32) -> (i32, i32) {
    %c0_i32 = arith.constant 0 : i32
    %c0_i32_0 = arith.constant 0 : i32
    return %c0_i32, %arg0 : i32, i32
  }
  func.func @transform_1(%arg0: i32) -> (i32, i32) {
    %c0_i32 = arith.constant 0 : i32
    %c0_i32_0 = arith.constant 0 : i32
    %c0_i32_1 = arith.constant 0 : i32
    return %c0_i32, %c0_i32_0 : i32, i32
  }
}

</mosaic_0001>

<bundles_post_ra>
// kernel: tpu_custom_call.1
= control target key start
LH: loop header
LB: loop body
LE: loop exit
PB: predicated region body
PF: predicated region fallthrough
CT: control target
= control target key end

     0   :  { %6 = vsyncpa [#allocation4], 0  ;;  %s242_s0 = inlined_call_operand.hbm [shape: bf16[8,256], index: 0, kind: input, shape index: {}]   ;;  %s243_s1 = inlined_call_operand.hbm [shape: f32[8,8], index: 1, kind: output, shape index: {}]  }
   0x1   :  { %7 = vsyncpa [#allocation5], 0  ;;  %s219_s6 = smov [#allocation3]  }
   0x2   :  { %s14_s7 = sshll.u32 %s219_s6, 4  ;;  %s15_s7 = int_to_ptr.vmem [resolvable:$true] %s14_s7 }
   0x3   :  { %s183_s8 = scalar_lea.vmem %s15_s7, 128  ;;  %p188_p1 = scmp.lt.s32.totalorder %s15_s7, %s15_s7 }
   0x4   :  { %p184_p0 = scmp.ne.s32.totalorder %s15_s7, %s183_s8  ;;  %p189_p2 = scmp.lt.s32.totalorder %s183_s8, %s183_s8 }
   0x6   :  { %p190_p3 = por %p189_p2, %p188_p1 }
   0x8   :  { %p191_p4 = pnand %p190_p3, %p184_p0 }
   0xa   :  { %194 = shalt.err (!%p191_p4)
}
   0xb   :  { %17 = dma.hbm_to_vmem [thread:$0]  %s242_s0, 128, %s15_s7, [#allocation4]  }
   0xc   :  { %215 = dma.done.wait [#allocation4], 128  }
   0xd   :  { %216 = vsyncadd [#allocation4], 4294967168  ;;  %vm26_vm0 = vcmask 64512   ;;  %v220_v0 = vmov 0.0   ;;  %vm221_vm1 = vmmov 1   ;;  %v28_v1 = vld [vmem:[#allocation3] sm:$0xff] }
   0xe   :  { %27 = vst.msk [vmem:[#allocation2] sm:$0xff] %vm26_vm0, %v220_v0  ;;  %vm96_vm2 = vmpackc.low %vm221_vm1, %vm221_vm1  ;;  %s222_s0 = smov [#allocation6]  }
   0xf   :  { %v97_v2 = vsel %vm96_vm2, %v28_v1, 0  ;;  %s158_s11 = sshll.u32 %s222_s0, 4  ;;  %s159_s11 = int_to_ptr.vmem [resolvable:$true] %s158_s11 }
  0x10   :  { %v170_v3 = vcombine.high %v97_v2, %v97_v2  ;;  %v169_v4 = vcombine.low %v97_v2, %v97_v2  ;;  %s195_s12 = scalar_lea.vmem %s159_s11, 128  ;;  %p200_p6 = scmp.lt.s32.totalorder %s159_s11, %s159_s11 }
  0x11   :  { %p196_p5 = scmp.ne.s32.totalorder %s159_s11, %s195_s12  ;;  %p201_p7 = scmp.lt.s32.totalorder %s195_s12, %s195_s12 }
  0x12   :  { %120 = vmatprep.subr.bf16.mxu0 %v170_v3  ;;  %138 = vmatprep.mubr.bf16.mxu0 %v170_v3 }
  0x13   :  { %121 = vmatpush1.bf16.xpose.msra.mxu0 %v169_v4  ;;  %p202_p8 = por %p201_p7, %p200_p6 }
  0x15   :  { %v98_v5 = vld [vmem:[#allocation2] sm:$0xff]  ;;  %p203_p9 = pnand %p202_p8, %p196_p5 }
  0x1a   :  { %139 = vmatmul.mubr.bf16.vlgmr.msra.gmra.mxu0 %v169_v4 }
  0xda   :  { %v140_v6 = vpop.f32.mrf.mxu0 }
  0xdb   :  { %v146_v7 = vadd.f32 %v140_v6, %v98_v5 }
  0xdc   :  { %v142_v8 = vpop.f32.mrf.mxu0 }
  0xdd   :  { %148 = vst.msk [vmem:[#allocation2] sm:$0xff] %vm26_vm0, %v146_v7 }
  0xde   :  { %v143_v9 = vpop.f32.mrf.mxu0 }
  0xe0   :  { %v144_v10 = vpop.f32.mrf.mxu0 }
  0xe4   :  { %v149_v11 = vld [vmem:[#allocation2] sm:$0xff] }
  0xe5   :  { %v150_v12 = vmul.f32 0.00048828125, %v149_v11 }
  0xe7   :  { %151 = vst.msk [vmem:[#allocation6] sm:$0xff] %vm26_vm0, %v150_v12 }
  0xe8   :  { %206 = shalt.err (!%p203_p9)
}
  0xe9   :  { %161 = dma.vmem_to_hbm [thread:$0]  %s159_s11, 128, %s243_s1, [#allocation5]  }
  0xea   :  { %217 = dma.done.wait [#allocation5], 128  }
  0xeb   :  { %218 = vsyncadd [#allocation5], 4294967168 }
  0xec   :  { %165 = vsyncpa [#allocation4], 1 }
  0xed   :  { %166 = vsyncpa [#allocation5], 1 }

</bundles_post_ra>
